<compile_context>
chip_gen: v5e
topology: v5e:2x2
jax: 0.10.0
libtpu: 0.0.40
codegen_flags: <defaults>
</compile_context>

<pallas_src>
import functools

import jax
import jax.numpy as jnp
from jax.experimental import pallas as pl
from jax.experimental.pallas import tpu as pltpu


def _round_up(x: int, m: int) -> int:
    return ((x + m - 1) // m) * m


def _crps_kernel(y_pred_ref, y_true_ref, q_ref, out_ref, *, inv_b):
    """One grid step: reduce a (Q, BLOCK_B) tile into the scalar accumulator.

    y_pred_ref: (Q, BLOCK_B) f32   (batch on lanes, quantiles on sublanes)
    y_true_ref: (1, BLOCK_B) f32
    q_ref     : (Q, 1)       f32
    out_ref   : (1, 1)       f32 in SMEM (accumulator, resident across grid)
    """
    i = pl.program_id(0)

    @pl.when(i == 0)
    def _init():
        out_ref[0, 0] = 0.0

    y_pred = y_pred_ref[...]          # (Q, BLOCK_B)
    y_true = y_true_ref[...]          # (1, BLOCK_B)
    q = q_ref[...]                    # (Q, 1)

    error = y_true - y_pred                                  # (Q, BLOCK_B)
    # max(q*e, (q-1)*e) == q*e + max(-e, 0): saves one multiply per element.
    pinball = q * error + jnp.maximum(-error, 0.0)           # (Q, BLOCK_B)

    # Fused reduction: raw sum per tile; divide by true B once at the end.
    out_ref[0, 0] += jnp.sum(pinball)

    @pl.when(i == pl.num_programs(0) - 1)
    def _finalize():
        out_ref[0, 0] = out_ref[0, 0] * inv_b


def crps_loss(y_pred, y_true, quantiles, *, block_b=8192):
    """Pallas wrapper.  y_pred: (B, Q), y_true: (B, 1) or (B,), quantiles: (Q,)."""
    y_pred = jnp.asarray(y_pred, jnp.float32)
    y_true = jnp.asarray(y_true, jnp.float32)
    if y_pred.ndim == 1:
        y_pred = y_pred[:, None]
    if y_true.ndim == 1:
        y_true = y_true[:, None]

    B, Q = y_pred.shape
    assert y_true.shape == (B, 1), "y_true must have shape (batch, 1)"
    assert Q == int(quantiles.shape[0]), "y_pred second dim must equal len(quantiles)"

    # Lane-dense layout: batch on the lane (last) axis.
    yp_t = y_pred.T                                         # (Q, B)
    yt_t = y_true.T                                         # (1, B)
    q = jnp.asarray(quantiles, jnp.float32).reshape(Q, 1)   # (Q, 1)

    # Tile the batch axis.  Lane dim of the block must be a multiple of 128,
    # so pad B up; zero-padded columns contribute 0 to the pinball sum.
    bb = min(int(block_b), _round_up(B, 128))
    b_pad = _round_up(B, bb)
    if b_pad != B:
        yp_t = jnp.pad(yp_t, ((0, 0), (0, b_pad - B)))
        yt_t = jnp.pad(yt_t, ((0, 0), (0, b_pad - B)))
    n_blocks = b_pad // bb

    inv_b = 1.0 / float(B)  # static compile-time constant
    kernel = functools.partial(_crps_kernel, inv_b=inv_b)

    out = pl.pallas_call(
        kernel,
        out_shape=jax.ShapeDtypeStruct((1, 1), jnp.float32),
        grid=(n_blocks,),
        in_specs=[
            pl.BlockSpec((Q, bb), lambda i: (0, i)),        # y_pred^T  (Q, BLOCK_B)
            pl.BlockSpec((1, bb), lambda i: (0, i)),        # y_true^T  (1, BLOCK_B)
            pl.BlockSpec((Q, 1), lambda i: (0, 0)),         # quantiles (constant block)
        ],
        out_specs=pl.BlockSpec(memory_space=pltpu.SMEM),    # scalar accumulator
        compiler_params=pltpu.CompilerParams(
            dimension_semantics=("arbitrary",)),            # reduction axis
    )(yp_t, yt_t, q)
    return out[0, 0]


def crps_ref(y_pred, y_true, quantiles):
    """Pure-JAX reference mirroring the PyTorch forward."""
    error = y_true - y_pred
    pin = jnp.maximum(quantiles[None, :] * error, (quantiles[None, :] - 1.0) * error)
    loss = jnp.sum(pin, axis=1, keepdims=True)
    return jnp.mean(loss)


if __name__ == "__main__":
    key = jax.random.PRNGKey(0)
    k1, k2 = jax.random.split(key)

    batch = 8
    quantiles = jnp.arange(0.1, 1.0, 0.1, dtype=jnp.float32)   # 9 quantiles
    n_q = quantiles.shape[0]

    y_pred = jax.random.normal(k1, (batch, n_q), dtype=jnp.float32)
    y_true = jax.random.normal(k2, (batch, 1), dtype=jnp.float32)

    loss = crps_loss(y_pred, y_true, quantiles)
    loss = jax.block_until_ready(loss)

    ref = crps_ref(y_pred, y_true, quantiles)
    assert jnp.allclose(loss, ref, rtol=1e-5, atol=1e-5), (loss, ref)

    # Also exercise a multi-tile, non-multiple-of-128 batch to cover tail padding.
    k3, k4 = jax.random.split(k2)
    big_b = 1000
    yp_big = jax.random.normal(k3, (big_b, n_q), dtype=jnp.float32)
    yt_big = jax.random.normal(k4, (big_b, 1), dtype=jnp.float32)
    loss_big = jax.block_until_ready(crps_loss(yp_big, yt_big, quantiles, block_b=512))
    ref_big = crps_ref(yp_big, yt_big, quantiles)
    assert jnp.allclose(loss_big, ref_big, rtol=1e-5, atol=1e-5), (loss_big, ref_big)

    print("KERNEL_OK")
</pallas_src>

<mosaic_0001>
module attributes {stable_mosaic.version = 11 : i64} {
  func.func @_crps_kernel(%arg0: i32, %arg1: memref<9x128xf32, #tpu.memory_space<vmem>>, %arg2: memref<1x128xf32, #tpu.memory_space<vmem>>, %arg3: memref<9x1xf32, #tpu.memory_space<vmem>>, %arg4: memref<1x1xf32, #tpu.memory_space<smem>>) attributes {dimension_semantics = [#tpu.dimension_semantics<arbitrary>], iteration_bounds = array<i64: 1>, scalar_prefetch = 0 : i64, scratch_operands = 0 : i64, tpu.core_type = #tpu.core_type<tc>, window_params = [{transform_indices = @transform_0, window_bounds = array<i64: 9, 128>}, {transform_indices = @transform_1, window_bounds = array<i64: 1, 128>}, {pipeline_mode = #tpu.pipeline_mode<synchronous>, transform_indices = @transform_2, window_bounds = array<i64: 9, 1>}, {transform_indices = @transform_3, window_bounds = array<i64: 1, 1>}]} {
    %c0_i32 = arith.constant 0 : i32
    %0 = arith.cmpi eq, %arg0, %c0_i32 : i32
    %1 = arith.extui %0 : i1 to i32
    %c0_i32_0 = arith.constant 0 : i32
    %2 = arith.cmpi ne, %1, %c0_i32_0 : i32
    scf.if %2 {
      %cst_14 = arith.constant 0.000000e+00 : f32
      %c0_15 = arith.constant 0 : index
      %c0_16 = arith.constant 0 : index
      %25 = memref.load %arg4[%c0_15, %c0_16] : memref<1x1xf32, #tpu.memory_space<smem>>
      memref.store %cst_14, %arg4[%c0_15, %c0_16] : memref<1x1xf32, #tpu.memory_space<smem>>
    } else {
    }
    %c0 = arith.constant 0 : index
    %c0_1 = arith.constant 0 : index
    %3 = vector.load %arg1[%c0, %c0_1] : memref<9x128xf32, #tpu.memory_space<vmem>>, vector<9x128xf32>
    %c0_2 = arith.constant 0 : index
    %c0_3 = arith.constant 0 : index
    %4 = vector.load %arg2[%c0_2, %c0_3] : memref<1x128xf32, #tpu.memory_space<vmem>>, vector<1x128xf32>
    %c0_4 = arith.constant 0 : index
    %c0_5 = arith.constant 0 : index
    %5 = vector.load %arg3[%c0_4, %c0_5] : memref<9x1xf32, #tpu.memory_space<vmem>>, vector<9x1xf32>
    %6 = vector.broadcast %4 : vector<1x128xf32> to vector<9x128xf32>
    %7 = arith.subf %6, %3 : vector<9x128xf32>
    %8 = vector.broadcast %5 : vector<9x1xf32> to vector<9x128xf32>
    %9 = arith.mulf %8, %7 : vector<9x128xf32>
    %cst = arith.constant 0.000000e+00 : f32
    %10 = vector.broadcast %cst : f32 to vector<9x128xf32>
    %11 = arith.subf %10, %7 : vector<9x128xf32>
    %cst_6 = arith.constant 0.000000e+00 : f32
    %12 = vector.broadcast %cst_6 : f32 to vector<9x128xf32>
    %13 = arith.maximumf %11, %12 : vector<9x128xf32>
    %14 = arith.addf %9, %13 : vector<9x128xf32>
    %c0_7 = arith.constant 0 : index
    %c0_8 = arith.constant 0 : index
    %15 = memref.load %arg4[%c0_7, %c0_8] : memref<1x1xf32, #tpu.memory_space<smem>>
    %16 = vector.shape_cast %14 : vector<9x128xf32> to vector<1x9x128xf32>
    %cst_9 = arith.constant dense<0.000000e+00> : vector<1xf32>
    %17 = vector.multi_reduction <add>, %16, %cst_9 [1, 2] : vector<1x9x128xf32> to vector<1xf32>
    %18 = vector.shape_cast %17 : vector<1xf32> to vector<1x1x1xf32>
    %19 = vector.extract %18[0, 0, 0] : f32 from vector<1x1x1xf32>
    %20 = arith.addf %15, %19 : f32
    %c0_10 = arith.constant 0 : index
    %c0_11 = arith.constant 0 : index
    %21 = memref.load %arg4[%c0_10, %c0_11] : memref<1x1xf32, #tpu.memory_space<smem>>
    memref.store %20, %arg4[%c0_10, %c0_11] : memref<1x1xf32, #tpu.memory_space<smem>>
    %c0_i32_12 = arith.constant 0 : i32
    %22 = arith.cmpi eq, %arg0, %c0_i32_12 : i32
    %23 = arith.extui %22 : i1 to i32
    %c0_i32_13 = arith.constant 0 : i32
    %24 = arith.cmpi ne, %23, %c0_i32_13 : i32
    scf.if %24 {
      %c0_14 = arith.constant 0 : index
      %c0_15 = arith.constant 0 : index
      %25 = memref.load %arg4[%c0_14, %c0_15] : memref<1x1xf32, #tpu.memory_space<smem>>
      %cst_16 = arith.constant 1.250000e-01 : f32
      %26 = arith.mulf %25, %cst_16 : f32
      %c0_17 = arith.constant 0 : index
      %c0_18 = arith.constant 0 : index
      %27 = memref.load %arg4[%c0_17, %c0_18] : memref<1x1xf32, #tpu.memory_space<smem>>
      memref.store %26, %arg4[%c0_17, %c0_18] : memref<1x1xf32, #tpu.memory_space<smem>>
    } else {
    }
    return
  }
  func.func @transform_0(%arg0: i32) -> (i32, i32) {
    %c0_i32 = arith.constant 0 : i32
    %c0_i32_0 = arith.constant 0 : i32
    return %c0_i32, %arg0 : i32, i32
  }
  func.func @transform_1(%arg0: i32) -> (i32, i32) {
    %c0_i32 = arith.constant 0 : i32
    %c0_i32_0 = arith.constant 0 : i32
    return %c0_i32, %arg0 : i32, i32
  }
  func.func @transform_2(%arg0: i32) -> (i32, i32) {
    %c0_i32 = arith.constant 0 : i32
    %c0_i32_0 = arith.constant 0 : i32
    %c0_i32_1 = arith.constant 0 : i32
    return %c0_i32, %c0_i32_0 : i32, i32
  }
  func.func @transform_3(%arg0: i32) -> (i32, i32) {
    %c0_i32 = arith.constant 0 : i32
    %c0_i32_0 = arith.constant 0 : i32
    %c0_i32_1 = arith.constant 0 : i32
    return %c0_i32, %c0_i32_0 : i32, i32
  }
}

</mosaic_0001>

<bundles_post_ra>
// kernel: tpu_custom_call.1
= control target key start
LH: loop header
LB: loop body
LE: loop exit
PB: predicated region body
PF: predicated region fallthrough
CT: control target
= control target key end

     0   :  { %v107_v1 = vmov 0   ;;  %s147_s0 = inlined_call_operand.vmem [shape: f32[9,128], index: 0, kind: input, shape index: {}]   ;;  %s148_s1 = inlined_call_operand.vmem [shape: f32[1,128], index: 1, kind: input, shape index: {}]   ;;  %s149_s2 = inlined_call_operand.vmem [shape: f32[9,1], index: 2, kind: input, shape index: {}]   ;;  %s150_s3 = inlined_call_operand.hbm [shape: f32[1,1], index: 3, kind: output, shape index: {}]  }
   0x1   :  { %v25_v0 = vld [vmem:[%s149_s2 + $0x8] sm:$0x1]  ;;  %91 = vset.pattern.permute.xlu0 %v107_v1 }
   0x2   :  { %8 = vsyncpa [#allocation3], 0  ;;  %38 = vperm.xlu0 %91, %v25_v0   ;;  %v24_v2 = vld [vmem:[%s149_s2] sm:$0xff]  ;;  %v22_v4 = vld [vmem:[%s147_s0 + $0x8] sm:$0x1]  ;;  %vm50_vm0 = vcmask 1040384  }
   0x3   :  { %v92_v3 = vld [vmem:[%s148_s1] ss:$0 sm:$0xff]  ;;  %s76_s2 = sshll.u32 %s150_s3, 4  ;;  %s108_s24 = smov [#allocation2]   ;;  %s77_s2 = int_to_ptr.hbm [resolvable:$true] %s76_s2 }
   0x4   :  { %v30_v5 = vsub.f32 %v92_v3, %v22_v4  ;;  %v21_v6 = vld [vmem:[%s147_s0] sm:$0xff] }
   0x5   :  { %v29_v7 = vsub.f32 %v92_v3, %v21_v6 }
   0x6   :  { %v44_v9 = vsub.f32 0.0, %v30_v5 }
   0x7   :  { %v43_v10 = vsub.f32 0.0, %v29_v7 }
   0x8   :  { %v46_v12 = vmax.f32 %v44_v9, 0.0 }
   0x9   :  { %v45_v13 = vmax.f32 %v43_v10, 0.0 }
   0xa   :  { %33 = vperm.xlu0 %91, %v24_v2  }
  0x74   :  { %v39_v8 = vpop.permute.xlu0 %38 }
  0x75   :  { %v42_v11 = vmul.f32 %v39_v8, %v30_v5 }
  0x77   :  { %v48_v14 = vadd.f32 %v46_v12, %v42_v11 }
  0x79   :  { %v51_v18 = vsel %vm50_vm0, %v48_v14, 0.0 }
  0x7c   :  { %v34_v15 = vpop.permute.xlu0 %33 }
  0x7d   :  { %v41_v16 = vmul.f32 %v34_v15, %v29_v7 }
  0x7f   :  { %v47_v17 = vadd.f32 %v45_v13, %v41_v16 }
  0x81   :  { %v52_v19 = vadd.f32 %v51_v18, %v47_v17 }
  0x83   :  { %53 = vadd.xlane.f32.xlu1 %v52_v19 }
  0xf6   :  { %v54_v20 = vpop.xlane.xlu1 %53 }
  0xf7   :  { %v55_v21 = vrot.slane %v54_v20, 4 }
  0xf9   :  { %v56_v22 = vadd.f32 %v55_v21, %v54_v20 }
  0xfb   :  { %v57_v23 = vrot.slane %v56_v22, 2 }
  0xfd   :  { %v58_v24 = vadd.f32 %v57_v23, %v56_v22 }
  0xff   :  { %v59_v25 = vrot.slane %v58_v24, 1 }
 0x101   :  { %v60_v26 = vadd.f32 %v59_v25, %v58_v24 }
 0x103   :  { %86 = vpush %v60_v26 }
 0x134   :  { %s87_s22 = spop %86 }
 0x135   :  { %s69_s23 = smul.f32 0.125, %s87_s22 }
 0x137   :  { %70 = sst [smem:[#allocation2]] %s69_s23 }
 0x138   :  { %79 = dma.smem_to_hbm %s108_s24, 16, %s77_s2, [#allocation3]  }
 0x139   :  { %105 = dma.done.wait [#allocation3], 16  }
 0x13a   :  { %106 = vsyncadd [#allocation3], 4294967280 }
 0x13b   :  { %84 = sfence }
 0x13c   :  { %85 = vsyncpa [#allocation3], 1 }

</bundles_post_ra>
